<compile_context>
chip_gen: v6e
topology: v6e:2x2x1
jax: 0.10.0
libtpu: 0.0.40
codegen_flags: <defaults>
</compile_context>

<pallas_src>
import jax
import jax.numpy as jnp
from jax.experimental import pallas as pl
from jax.experimental.pallas import tpu as pltpu

INPUT_SIZE = 10
HIDDEN_SIZES = [64, 32]
OUTPUT_SIZE = 1
LANE = 128
MAX_TB = 16384  # keeps the live set < v5e's 16 MiB scoped-VMEM default


def _round_up(n, m):
    return ((n + m - 1) // m) * m


def mlp_kernel(x_ref, w1_ref, b1_ref, w2_ref, b2_ref, w3_ref, b3_ref, o_ref):
    # x_ref: (INPUT_SIZE, TB) bf16, batch on lanes.
    # w*_ref: (out, in) bf16 ; b*_ref: (out, 1) f32 (broadcast over lanes).
    x = x_ref[...]

    # Layer 1: (64,10) @ (10,TB) -> (64,TB), f32 accumulate on the MXU.
    h1 = jnp.dot(w1_ref[...], x, preferred_element_type=jnp.float32)
    h1 = jnp.maximum(h1 + b1_ref[...], 0.0)

    # Layer 2: (32,64) @ (64,TB) -> (32,TB).
    h2 = jnp.dot(w2_ref[...], h1.astype(w2_ref.dtype),
                 preferred_element_type=jnp.float32)
    h2 = jnp.maximum(h2 + b2_ref[...], 0.0)

    # Layer 3: (1,32) @ (32,TB) -> (1,TB); lane-dense (TB multiple of 128).
    h3 = jnp.dot(w3_ref[...], h2.astype(w3_ref.dtype),
                 preferred_element_type=jnp.float32)
    o_ref[...] = (h3 + b3_ref[...]).astype(o_ref.dtype)


def _resident_spec(shape):
    """Full-array, constant-index block. Single-buffered: it never changes."""
    try:
        return pl.BlockSpec(shape, lambda i: (0, 0),
                            pipeline_mode=pl.Buffered(1))
    except TypeError:  # older jax without pipeline_mode kwarg
        return pl.BlockSpec(shape, lambda i: (0, 0))


def mlp_forward(x, params, *, block_batch=4096):
    """x: [B, INPUT_SIZE] f32. params: PyTorch-convention weights/biases."""
    B = x.shape[0]

    # --- batch tiling ------------------------------------------------------
    Bp0 = _round_up(B, LANE)
    tb = min(_round_up(block_batch, LANE), Bp0, MAX_TB)
    # v7x has 2 TensorCores: keep at least 2 grid steps when the batch allows,
    # so the "parallel" axis actually has work to shard (no-op on v5e/v6e).
    if tb >= Bp0 and Bp0 >= 2 * LANE:
        tb = _round_up((Bp0 + 1) // 2, LANE)
    Bp = _round_up(B, tb)

    # --- wrapper-side layout plumbing (single fused pass) -------------------
    # transpose + cast + zero-pad in one XLA op; pad lanes are zero (finite)
    # and dropped on return.
    xt = jnp.pad(x.T.astype(jnp.bfloat16), ((0, 0), (0, Bp - B)))
    w1 = params["w1"].astype(jnp.bfloat16)                          # (64, 10)
    w2 = params["w2"].astype(jnp.bfloat16)                          # (32, 64)
    w3 = params["w3"].astype(jnp.bfloat16)                          # (1, 32)
    b1 = params["b1"].reshape(HIDDEN_SIZES[0], 1).astype(jnp.float32)
    b2 = params["b2"].reshape(HIDDEN_SIZES[1], 1).astype(jnp.float32)
    b3 = params["b3"].reshape(OUTPUT_SIZE, 1).astype(jnp.float32)

    grid = (Bp // tb,)

    flops = 2 * Bp * (INPUT_SIZE * HIDDEN_SIZES[0]
                      + HIDDEN_SIZES[0] * HIDDEN_SIZES[1]
                      + HIDDEN_SIZES[1] * OUTPUT_SIZE)
    bytes_accessed = (xt.size * 2
                      + (w1.size + w2.size + w3.size) * 2
                      + (b1.size + b2.size + b3.size) * 4
                      + Bp * OUTPUT_SIZE * 4)

    out = pl.pallas_call(
        mlp_kernel,
        out_shape=jax.ShapeDtypeStruct((OUTPUT_SIZE, Bp), jnp.float32),
        grid=grid,
        in_specs=[
            # x: tiled along the batch (lane) axis; double-buffered pipeline.
            pl.BlockSpec((INPUT_SIZE, tb), lambda i: (0, i)),
            # Weights / biases: VMEM-resident, single-buffered.
            _resident_spec(w1.shape), _resident_spec(b1.shape),
            _resident_spec(w2.shape), _resident_spec(b2.shape),
            _resident_spec(w3.shape), _resident_spec(b3.shape),
        ],
        out_specs=pl.BlockSpec((OUTPUT_SIZE, tb), lambda i: (0, i)),
        compiler_params=pltpu.CompilerParams(
            dimension_semantics=("parallel",)),
        cost_estimate=pl.CostEstimate(
            flops=flops, transcendentals=0, bytes_accessed=bytes_accessed),
    )(xt, w1, b1, w2, b2, w3, b3)

    # Back to the module's [B, OUTPUT_SIZE] convention, dropping padding.
    return out[:, :B].T


def init_params(key):
    """PyTorch nn.Linear-style init: W [out, in], b [out], U(-1/sqrt(fan_in), ...)."""
    def linear(key, fan_in, fan_out):
        kw, kb = jax.random.split(key)
        bound = 1.0 / jnp.sqrt(fan_in)
        w = jax.random.uniform(kw, (fan_out, fan_in), jnp.float32, -bound, bound)
        b = jax.random.uniform(kb, (fan_out,), jnp.float32, -bound, bound)
        return w, b

    k1, k2, k3 = jax.random.split(key, 3)
    w1, b1 = linear(k1, INPUT_SIZE, HIDDEN_SIZES[0])
    w2, b2 = linear(k2, HIDDEN_SIZES[0], HIDDEN_SIZES[1])
    w3, b3 = linear(k3, HIDDEN_SIZES[1], OUTPUT_SIZE)
    return {"w1": w1, "b1": b1, "w2": w2, "b2": b2, "w3": w3, "b3": b3}


def mlp_reference(x, p):
    h = jnp.maximum(x @ p["w1"].T + p["b1"], 0.0)
    h = jnp.maximum(h @ p["w2"].T + p["b2"], 0.0)
    return h @ p["w3"].T + p["b3"]


if __name__ == "__main__":
    key = jax.random.PRNGKey(0)
    kx, kp = jax.random.split(key)

    batch = 1000  # pads to 1024 and splits into 2 grid steps of 512 lanes
    x = jax.random.normal(kx, (batch, INPUT_SIZE), jnp.float32)
    params = init_params(kp)

    out = mlp_forward(x, params)
    out = jax.block_until_ready(out)

    ref = mlp_reference(x, params)
    assert out.shape == (batch, OUTPUT_SIZE)
    # bf16 matmul operands with f32 accumulation -> loose-but-safe tolerance.
    assert jnp.allclose(out, ref, atol=3e-2, rtol=3e-2), (
        float(jnp.max(jnp.abs(out - ref))))

    print("KERNEL_OK")
</pallas_src>

<mosaic_0001>
module attributes {stable_mosaic.version = 11 : i64} {
  func.func @mlp_kernel(%arg0: i32, %arg1: memref<10x512xbf16, #tpu.memory_space<vmem>>, %arg2: memref<64x10xbf16, #tpu.memory_space<vmem>>, %arg3: memref<64x1xf32, #tpu.memory_space<vmem>>, %arg4: memref<32x64xbf16, #tpu.memory_space<vmem>>, %arg5: memref<32x1xf32, #tpu.memory_space<vmem>>, %arg6: memref<1x32xbf16, #tpu.memory_space<vmem>>, %arg7: memref<1x1xf32, #tpu.memory_space<vmem>>, %arg8: memref<1x512xf32, #tpu.memory_space<vmem>>) attributes {dimension_semantics = [#tpu.dimension_semantics<parallel>], iteration_bounds = array<i64: 2>, scalar_prefetch = 0 : i64, scratch_operands = 0 : i64, tpu.core_type = #tpu.core_type<tc>, window_params = [{transform_indices = @transform_0, window_bounds = array<i64: 10, 512>}, {pipeline_mode = #tpu.pipeline_mode<synchronous>, transform_indices = @transform_1, window_bounds = array<i64: 64, 10>}, {pipeline_mode = #tpu.pipeline_mode<synchronous>, transform_indices = @transform_2, window_bounds = array<i64: 64, 1>}, {pipeline_mode = #tpu.pipeline_mode<synchronous>, transform_indices = @transform_3, window_bounds = array<i64: 32, 64>}, {pipeline_mode = #tpu.pipeline_mode<synchronous>, transform_indices = @transform_4, window_bounds = array<i64: 32, 1>}, {pipeline_mode = #tpu.pipeline_mode<synchronous>, transform_indices = @transform_5, window_bounds = array<i64: 1, 32>}, {pipeline_mode = #tpu.pipeline_mode<synchronous>, transform_indices = @transform_6, window_bounds = array<i64: 1, 1>}, {transform_indices = @transform_7, window_bounds = array<i64: 1, 512>}]} {
    %c0 = arith.constant 0 : index
    %c0_0 = arith.constant 0 : index
    %0 = vector.load %arg1[%c0, %c0_0] : memref<10x512xbf16, #tpu.memory_space<vmem>>, vector<10x512xbf16>
    %c0_1 = arith.constant 0 : index
    %c0_2 = arith.constant 0 : index
    %1 = vector.load %arg2[%c0_1, %c0_2] : memref<64x10xbf16, #tpu.memory_space<vmem>>, vector<64x10xbf16>
    %cst = arith.constant dense<0.000000e+00> : vector<64x512xf32>
    %2 = tpu.matmul %1, %0, %cst {dimension_numbers = #tpu.dot_dimension_numbers<[1], [0], [0], [1], [0, 0, 1, 1], [], []>} : vector<64x10xbf16>, vector<10x512xbf16>, vector<64x512xf32> -> vector<64x512xf32>
    %c0_3 = arith.constant 0 : index
    %c0_4 = arith.constant 0 : index
    %3 = vector.load %arg3[%c0_3, %c0_4] : memref<64x1xf32, #tpu.memory_space<vmem>>, vector<64x1xf32>
    %4 = vector.broadcast %3 : vector<64x1xf32> to vector<64x512xf32>
    %5 = arith.addf %2, %4 : vector<64x512xf32>
    %cst_5 = arith.constant 0.000000e+00 : f32
    %6 = vector.broadcast %cst_5 : f32 to vector<64x512xf32>
    %7 = arith.maximumf %5, %6 : vector<64x512xf32>
    %c0_6 = arith.constant 0 : index
    %c0_7 = arith.constant 0 : index
    %8 = vector.load %arg4[%c0_6, %c0_7] : memref<32x64xbf16, #tpu.memory_space<vmem>>, vector<32x64xbf16>
    %9 = arith.truncf %7 : vector<64x512xf32> to vector<64x512xbf16>
    %cst_8 = arith.constant dense<0.000000e+00> : vector<32x512xf32>
    %10 = tpu.matmul %8, %9, %cst_8 {dimension_numbers = #tpu.dot_dimension_numbers<[1], [0], [0], [1], [0, 0, 1, 1], [], []>} : vector<32x64xbf16>, vector<64x512xbf16>, vector<32x512xf32> -> vector<32x512xf32>
    %c0_9 = arith.constant 0 : index
    %c0_10 = arith.constant 0 : index
    %11 = vector.load %arg5[%c0_9, %c0_10] : memref<32x1xf32, #tpu.memory_space<vmem>>, vector<32x1xf32>
    %12 = vector.broadcast %11 : vector<32x1xf32> to vector<32x512xf32>
    %13 = arith.addf %10, %12 : vector<32x512xf32>
    %cst_11 = arith.constant 0.000000e+00 : f32
    %14 = vector.broadcast %cst_11 : f32 to vector<32x512xf32>
    %15 = arith.maximumf %13, %14 : vector<32x512xf32>
    %c0_12 = arith.constant 0 : index
    %c0_13 = arith.constant 0 : index
    %16 = vector.load %arg6[%c0_12, %c0_13] : memref<1x32xbf16, #tpu.memory_space<vmem>>, vector<1x32xbf16>
    %17 = arith.truncf %15 : vector<32x512xf32> to vector<32x512xbf16>
    %cst_14 = arith.constant dense<0.000000e+00> : vector<1x512xf32>
    %18 = tpu.matmul %16, %17, %cst_14 {dimension_numbers = #tpu.dot_dimension_numbers<[1], [0], [0], [1], [0, 0, 1, 1], [], []>} : vector<1x32xbf16>, vector<32x512xbf16>, vector<1x512xf32> -> vector<1x512xf32>
    %c0_15 = arith.constant 0 : index
    %c0_16 = arith.constant 0 : index
    %19 = vector.load %arg7[%c0_15, %c0_16] : memref<1x1xf32, #tpu.memory_space<vmem>>, vector<1x1xf32>
    %20 = vector.broadcast %19 : vector<1x1xf32> to vector<1x512xf32>
    %21 = arith.addf %18, %20 : vector<1x512xf32>
    %c0_17 = arith.constant 0 : index
    %c0_18 = arith.constant 0 : index
    %22 = vector.load %arg8[%c0_17, %c0_18] : memref<1x512xf32, #tpu.memory_space<vmem>>, vector<1x512xf32>
    tpu.vector_store %arg8[%c0_17, %c0_18], %21 {strides = array<i32>} : memref<1x512xf32, #tpu.memory_space<vmem>>, vector<1x512xf32>,
    return
  }
  func.func @transform_0(%arg0: i32) -> (i32, i32) {
    %c0_i32 = arith.constant 0 : i32
    %c0_i32_0 = arith.constant 0 : i32
    return %c0_i32, %arg0 : i32, i32
  }
  func.func @transform_1(%arg0: i32) -> (i32, i32) {
    %c0_i32 = arith.constant 0 : i32
    %c0_i32_0 = arith.constant 0 : i32
    %c0_i32_1 = arith.constant 0 : i32
    return %c0_i32, %c0_i32_0 : i32, i32
  }
  func.func @transform_2(%arg0: i32) -> (i32, i32) {
    %c0_i32 = arith.constant 0 : i32
    %c0_i32_0 = arith.constant 0 : i32
    %c0_i32_1 = arith.constant 0 : i32
    return %c0_i32, %c0_i32_0 : i32, i32
  }
  func.func @transform_3(%arg0: i32) -> (i32, i32) {
    %c0_i32 = arith.constant 0 : i32
    %c0_i32_0 = arith.constant 0 : i32
    %c0_i32_1 = arith.constant 0 : i32
    return %c0_i32, %c0_i32_0 : i32, i32
  }
  func.func @transform_4(%arg0: i32) -> (i32, i32) {
    %c0_i32 = arith.constant 0 : i32
    %c0_i32_0 = arith.constant 0 : i32
    %c0_i32_1 = arith.constant 0 : i32
    return %c0_i32, %c0_i32_0 : i32, i32
  }
  func.func @transform_5(%arg0: i32) -> (i32, i32) {
    %c0_i32 = arith.constant 0 : i32
    %c0_i32_0 = arith.constant 0 : i32
    %c0_i32_1 = arith.constant 0 : i32
    return %c0_i32, %c0_i32_0 : i32, i32
  }
  func.func @transform_6(%arg0: i32) -> (i32, i32) {
    %c0_i32 = arith.constant 0 : i32
    %c0_i32_0 = arith.constant 0 : i32
    %c0_i32_1 = arith.constant 0 : i32
    return %c0_i32, %c0_i32_0 : i32, i32
  }
  func.func @transform_7(%arg0: i32) -> (i32, i32) {
    %c0_i32 = arith.constant 0 : i32
    %c0_i32_0 = arith.constant 0 : i32
    return %c0_i32, %arg0 : i32, i32
  }
}

</mosaic_0001>

<bundles_post_ra>
// kernel: tpu_custom_call.1
= control target key start
LH: loop header
LB: loop body
LE: loop exit
PB: predicated region body
PF: predicated region fallthrough
CT: control target
= control target key end

     0   :  { %s1465_s0 = inlined_call_operand.vmem [shape: bf16[10,1024], index: 0, kind: input, shape index: {}]   ;;  %s1466_s1 = inlined_call_operand.vmem [shape: bf16[64,10], index: 1, kind: input, shape index: {}]   ;;  %s1467_s2 = inlined_call_operand.vmem [shape: f32[64,1], index: 2, kind: input, shape index: {}]   ;;  %s1468_s3 = inlined_call_operand.vmem [shape: bf16[32,64], index: 3, kind: input, shape index: {}]   ;;  %s1469_s4 = inlined_call_operand.vmem [shape: f32[32,1], index: 4, kind: input, shape index: {}]   ;;  %s1470_s5 = inlined_call_operand.vmem [shape: bf16[1,32], index: 5, kind: input, shape index: {}]   ;;  %s1471_s6 = inlined_call_operand.<no memory space> [shape: f32[1,1], index: 6, kind: input, shape index: {}]   ;;  %s1472_s7 = inlined_call_operand.hbm [shape: f32[1,1024], index: 7, kind: output, shape index: {}]  }
   0x1   :  { %v12_v0 = vstv %s1471_s6 }
   0x2   :  { %13 = vst [vmem:[#allocation2] sm:$0x1] %v12_v0 }
   0x3   :  { %14 = vsyncpa [#allocation5], 0 }
   0x4   :  { %16 = vsyncpa [#allocation5 + $0x1], 0  ;;  %s1215_s26 = smov 0   ;;  %s1217_s27 = smov 0  }
   0x5   :  { %s1219_s28 = smov 0   ;;  %s1221_s29 = smov 0  }
   0x6 LB: > { %s1009_s6 = sadd.s32 4294967295, %s1167_s29   ;;  %s1010_s30 = sadd.s32 4294967294, %s1167_s29   ;;  %s1167_s29 = sphi %s1221_s29, %s1480_s29   ;;  %s1163_s28 = sphi %s1219_s28, %s1479_s28   ;;  %s1159_s27 = sphi %s1217_s27, %s1478_s27   ;;  %s1155_s26 = sphi %s1215_s26, %s1477_s26  }
   0x7   : > { %s1238_s8 = sadd.s32 1, %s1167_s29   ;;  %s29_s9 = sadd.s32 1, %s1163_s28 }
   0x8   : > { %s26_s10 = ssub.s32 %s1167_s29, %s1238_s8  ;;  %p36_p0 = scmp.ne.s32.totalorder %s1163_s28, %s1159_s27 }
   0x9   : > { %p27_p1 = scmp.eq.s32.totalorder %s26_s10, 0  ;;  %p37_p2 = scmp.eq.s32.totalorder %s1167_s29, 0 }
   0xa   : > { %p192_p3 = scmp.eq.s32.totalorder %s1009_s6, 1  ;;  %p197_p4 = scmp.ne.s32.totalorder %s1159_s27, %s1155_s26 }
   0xb   : > { %s1251_s11 = scalar_select %p27_p1, %s1163_s28, %s29_s9  }
   0xc   : > { %p38_p5 = por %p37_p2, %p36_p0  ;;  %p1253_p6 = por %p192_p3, %p36_p0 }
   0xd   : > { %p198_p7 = scmp.eq.s32.totalorder %s1010_s30, 1  ;;  %p1473_p9 = scmp.ge.s32.totalorder %s1167_s29, 2 }
   0xf   : > { %p1257_p8 = por %p198_p7, %p197_p4  ;;  %232 = sbr.rel (%p1473_p9) target bundleno = 26 (0x1a), region = 40 }
  0x14   : > { %235 = sbr.rel (!%p38_p5) target bundleno = 26 (0x1a), region = 44  ;;  %s237_s14 = sand.u32 (%p38_p5), 1, %s1163_s28  }
  0x15   : > { %s1050_s15 = sshll.u32 (%p38_p5), %s1167_s29, 4  ;;  %s1013_s16 = sshll.u32 (%p38_p5), %s237_s14, 5 }
  0x16   : > { %s242_s19 = scalar_lea.vmem (%p38_p5), %s1465_s0, %s1050_s15  ;;  %s239_s20 = scalar_lea.vmem (%p38_p5), [#allocation3], %s1013_s16 }
  0x17   : > { %v255_v1 = vld [vmem:[%s242_s19] sm:$0xff] (%p38_p5)  ;;  %v257_v2 = vld [vmem:[%s242_s19 + $0x8] sm:$0xff] (%p38_p5) }
  0x18   : > { %v259_v3 = vld [vmem:[%s242_s19 + $0x20] sm:$0xff] (%p38_p5)  ;;  %256 = vst [vmem:[%s239_s20] sm:$0xff] (%p38_p5), %v255_v1  ;;  %258 = vst [vmem:[%s239_s20 + $0x8] sm:$0xff] (%p38_p5), %v257_v2  ;;  %v261_v4 = vld [vmem:[%s242_s19 + $0x28] sm:$0xff] (%p38_p5) }
  0x19   : > { %260 = vst [vmem:[%s239_s20 + $0x10] sm:$0xff] %v259_v3  ;;  %262 = vst [vmem:[%s239_s20 + $0x18] sm:$0xff] %v261_v4 }
  0x1a PF: > { %p1016_p10 = scmp.ge.s32.totalorder %s1167_s29, 1  ;;  %p267_p11 = scmp.lt.s32.totalorder %s1167_s29, 3 }
  0x1c   : > { %p268_p12 = pnand %p1016_p10, %p267_p11 }
  0x1d   : > { %s1272_s21 = sand.u32 (!%p268_p12), 1, %s1159_s27   ;;  %s1051_s20 = sshll.u32 (!%p268_p12), %s1009_s6, 6 }
  0x1e   : > { %271 = sbr.rel (%p268_p12) target bundleno = 726 (0x2d6), region = 67  ;;  %s1017_s22 = sshll.u32 (!%p268_p12), %s1272_s21, 5 }
  0x1f   : > { %s276_s23 = scalar_lea.vmem (!%p268_p12), [#allocation3], %s1017_s22  ;;  %s1018_s19 = sshll.u32 (!%p268_p12), %s1272_s21, 2 }
  0x20   : > { %s304_s22 = scalar_lea.vmem (!%p268_p12), [#allocation4], %s1018_s19  ;;  %s943_s30 = scalar_lea.hbm (!%p268_p12), %s1472_s7, %s1051_s20 }
  0x21   : > { %s931_s9 = scalar_lea.sflag (!%p268_p12), [#allocation5], %s1272_s21  ;;  %s1171_s14 = smov (!%p268_p12), [#allocation4]  }
  0x22   : > { %s1111_s15 = sshll.u32 (!%p268_p12), %s1171_s14, 4  ;;  %s1112_s15 = int_to_ptr.vmem [resolvable:$false] %s1111_s15 }
  0x23   : > { %v1169_v5 = vmov 0   ;;  %vm417_vm0 = vcmask 1044480   ;;  %v1095_v6 = vld [vmem:[%s276_s23 + $0x4] ss:$16 sps:$4 sm:$0x1f]   ;;  %vm404_vm1 = vcmask 80896  }
  0x24   : > { %462 = vmatprep.mubr.bf16.mxu0 %v1169_v5  ;;  %535 = vmatprep.mubr.bf16.mxu1 %v1169_v5  ;;  %v1097_v7 = vld [vmem:[%s276_s23 + $0xc] ss:$16 sps:$4 sm:$0x1f]   ;;  %v1099_v8 = vld [vmem:[%s276_s23] ss:$16 sps:$4 sm:$0x1f]  }
  0x25   : > { %1093 = vset.pattern.permute.xlu0 %v1169_v5  ;;  %1094 = vset.pattern.permute.xlu1 %v1169_v5  ;;  %v1100_v9 = vld [vmem:[%s276_s23 + $0x8] ss:$16 sps:$4 sm:$0x1f]   ;;  %v419_v10 = vsel %vm417_vm0, %v1099_v8, 0  ;;  %v1101_v12 = vld [vmem:[%s1466_s1] sm:$0xff]   ;;  %v326_v13 = vld [vmem:[%s1467_s2 + $0x30] sm:$0xff] }
  0x26   : > { %1027 = vmatprep.subr.msk.bf16.mxu0 %vm417_vm0, %v1095_v6  ;;  %1032 = vmatprep.subr.msk.bf16.mxu1 %vm417_vm0, %v1097_v7  ;;  %v425_v11 = vsel %vm417_vm0, %v1100_v9, 0  ;;  %v324_v14 = vld [vmem:[%s1467_s2 + $0x20] sm:$0xff]  ;;  %v327_v15 = vld [vmem:[%s1467_s2 + $0x38] sm:$0xff]  ;;  %v325_v16 = vld [vmem:[%s1467_s2 + $0x28] sm:$0xff]  ;;  %vm662_vm2 = vcmask 523264   ;;  %vm810_vm3 = vcmask 261120  }
  0x27   : > { %445 = vmatpush1.bf16.msra.mxu0 %v419_v10  ;;  %518 = vmatpush1.bf16.msra.mxu1 %v425_v11  ;;  %v322_v17 = vld [vmem:[%s1467_s2 + $0x10] sm:$0xff]  ;;  %v323_v18 = vld [vmem:[%s1467_s2 + $0x18] sm:$0xff]  ;;  %v1102_v19 = vld [vmem:[%s1466_s1 + $0x8] sm:$0xff]   ;;  %s945_s23 = sshll.u32 %s304_s22, 4  ;;  %s1113_s6 = scalar_lea.vmem %s1112_s15, 128  ;;  %s946_s23 = int_to_ptr.vmem [resolvable:$true] %s945_s23 }
  0x28   : > { %360 = vperm.xlu0 %1093, %v326_v13   ;;  %350 = vperm.xlu1 %1094, %v324_v14   ;;  %v320_v20 = vld [vmem:[%s1467_s2] sm:$0xff]  ;;  %v321_v21 = vld [vmem:[%s1467_s2 + $0x8] sm:$0xff]  ;;  %v630_v22 = vld [vmem:[%s1469_s4 + $0x10] sm:$0xff]  ;;  %s1107_s10 = scalar_lea.vmem %s946_s23, 64  ;;  %p1114_p2 = scmp.lt.s32.totalorder %s946_s23, %s1112_s15 }
  0x29   : > { %v631_v23 = vld [vmem:[%s1469_s4 + $0x18] sm:$0xff]  ;;  %v1103_v24 = vld [vmem:[%s1466_s1 + $0x10] sm:$0xff]   ;;  %v628_v25 = vld [vmem:[%s1469_s4] sm:$0xff]  ;;  %p1108_p13 = scmp.ne.s32.totalorder %s946_s23, %s1107_s10  ;;  %p1115_p3 = scmp.lt.s32.totalorder %s1113_s6, %s1107_s10 }
  0x2a   : > { %1028 = vmatmul.mubr.msk.bf16.vlgmr.msra.gmra.mxu0 %vm404_vm1, %v1101_v12  ;;  %1033 = vmatmul.mubr.msk.bf16.vlgmr.msra.gmra.mxu1 %vm404_vm1, %v1101_v12  ;;  %v629_v26 = vld [vmem:[%s1469_s4 + $0x8] sm:$0xff]  ;;  %v800_v27 = vld [vmem:[#allocation2] sm:$0x1]  ;;  %v1104_v28 = vld [vmem:[%s1466_s1 + $0x18] sm:$0xff]  }
  0x2b   : > { %472 = vmatprep.mubr.bf16.mxu0 %v1169_v5  ;;  %545 = vmatprep.mubr.bf16.mxu1 %v1169_v5  ;;  %p1109_p0 = pnand %p1108_p13, %p1253_p6  ;;  %p1116_p4 = por %p1115_p3, %p1114_p2 }
  0x2c   : > { %365 = vperm.xlu0 %1093, %v327_v15   ;;  %355 = vperm.xlu1 %1094, %v325_v16  }
  0x2d   : > { %p1110_p1 = pneg %p1109_p0 }
  0x2f   : > { %p1117_p5 = pnand %p1116_p4, %p1110_p1 }
  0x30   : > { %340 = vperm.xlu0 %1093, %v322_v17   ;;  %345 = vperm.xlu1 %1094, %v323_v18  }
  0x32   : > { %1029 = vmatmul.mubr.msk.bf16.gmra.mxu0 %vm404_vm1, %v1102_v19  ;;  %1034 = vmatmul.mubr.msk.bf16.gmra.mxu1 %vm404_vm1, %v1102_v19 }
  0x33   : > { %482 = vmatprep.mubr.bf16.mxu0 %v1169_v5  ;;  %555 = vmatprep.mubr.bf16.mxu1 %v1169_v5 }
  0x34   : > { %330 = vperm.xlu0 %1093, %v320_v20   ;;  %335 = vperm.xlu1 %1094, %v321_v21  }
  0x38   : > { %644 = vperm.xlu0 %1093, %v630_v22   ;;  %649 = vperm.xlu1 %1094, %v631_v23  }
  0x3a   : > { %1030 = vmatmul.mubr.msk.bf16.gmra.mxu0 %vm404_vm1, %v1103_v24  ;;  %1035 = vmatmul.mubr.msk.bf16.gmra.mxu1 %vm404_vm1, %v1103_v24 }
  0x3b   : > { %492 = vmatprep.mubr.bf16.mxu0 %v1169_v5  ;;  %565 = vmatprep.mubr.bf16.mxu1 %v1169_v5 }
  0x3c   : > { %634 = vperm.xlu0 %1093, %v628_v25   ;;  %639 = vperm.xlu1 %1094, %v629_v26  }
  0x40   : > { %803 = vperm.xlu0 %1093, %v800_v27  }
  0x42   : > { %1031 = vmatmul.mubr.msk.bf16.gmra.mxu0 %vm404_vm1, %v1104_v28  ;;  %1036 = vmatmul.mubr.msk.bf16.gmra.mxu1 %vm404_vm1, %v1104_v28 }
  0x43   : > { %701 = vmatprep.mubr.bf16.mxu0 %v1169_v5  ;;  %754 = vmatprep.mubr.bf16.mxu1 %v1169_v5 }
  0xa3   : > { %v361_v37 = vpop.permute.xlu0 %360  ;;  %v1351_v38 = vpop.permute.xlu1 %350 }
  0xa7   : > { %v366_v45 = vpop.permute.xlu0 %365  ;;  %v356_v46 = vpop.permute.xlu1 %355 }
  0xab   : > { %v1357_v53 = vpop.permute.xlu0 %340  ;;  %v346_v54 = vpop.permute.xlu1 %345 }
  0xaf   : > { %v1359_v61 = vpop.permute.xlu0 %330  ;;  %v1361_v62 = vpop.permute.xlu1 %335 }
  0xea   : > { %v1343_v29 = vpop.f32.mrf.mxu0  ;;  %v1345_v30 = vpop.f32.mrf.mxu1 }
  0xec   : > { %v466_v31 = vpop.f32.mrf.mxu0  ;;  %v539_v32 = vpop.f32.mrf.mxu1 }
  0xed   : > { %v1364_v63 = vadd.f32 %v466_v31, %v1359_v61  ;;  %v1367_v0 = vadd.f32 %v539_v32, %v1359_v61 }
  0xee   : > { %v1347_v33 = vpop.f32.mrf.mxu0  ;;  %v1349_v34 = vpop.f32.mrf.mxu1 }
  0xf0   : > { %v470_v35 = vpop.f32.mrf.mxu0  ;;  %v543_v36 = vpop.f32.mrf.mxu1 }
  0xf1   : > { %v1370_v1 = vadd.f32 %v470_v35, %v1361_v62  ;;  %v1373_v2 = vadd.f32 %v543_v36, %v1361_v62 }
  0xf2   : > { %v1353_v39 = vpop.f32.mrf.mxu0  ;;  %v1355_v40 = vpop.f32.mrf.mxu1 }
  0xf4   : > { %v476_v41 = vpop.f32.mrf.mxu0  ;;  %v549_v42 = vpop.f32.mrf.mxu1 }
  0xf5   : > { %v1376_v6 = vadd.f32 %v476_v41, %v1357_v53  ;;  %v1379_v7 = vadd.f32 %v549_v42, %v1357_v53 }
  0xf6   : > { %v478_v43 = vpop.f32.mrf.mxu0  ;;  %v551_v44 = vpop.f32.mrf.mxu1 }
  0xf7   : > { %v1381_v8 = vadd.f32 %v478_v43, %v346_v54  ;;  %v1383_v9 = vadd.f32 %v551_v44, %v346_v54 }
  0xf8   : > { %v480_v47 = vpop.f32.mrf.mxu0  ;;  %v553_v48 = vpop.f32.mrf.mxu1 }
  0xf9   : > { %v1385_v10 = vadd.f32 %v480_v47, %v346_v54  ;;  %v1387_v11 = vadd.f32 %v553_v48, %v346_v54 }
  0xfa   : > { %v484_v49 = vpop.f32.mrf.mxu0  ;;  %v557_v50 = vpop.f32.mrf.mxu1 }
  0xfb   : > { %v485_v48 = vadd.f32 %v484_v49, %v1351_v38  ;;  %v548_v49 = vadd.f32 %v1355_v40, %v1357_v53  ;;  %v590_v40 = vmax.f32 %v1383_v9, 0.0  ;;  %v579_v9 = vmax.f32 %v1367_v0, 0.0  ;;  %v1106_v0 = vld [vmem:[%s1468_s3 + $0x8] sm:$0xff]  }
  0xfc   : > { %v486_v51 = vpop.f32.mrf.mxu0  ;;  %v559_v52 = vpop.f32.mrf.mxu1 }
  0xfd   : > { %v487_v20 = vadd.f32 %v486_v51, %v1351_v38  ;;  %v560_v21 = vadd.f32 %v559_v52, %v1351_v38  ;;  %v558_v51 = vadd.f32 %v557_v50, %v1351_v38  ;;  %v475_v38 = vadd.f32 %v1353_v39, %v1357_v53 }
  0xfe   : > { %v488_v55 = vpop.f32.mrf.mxu0  ;;  %v561_v56 = vpop.f32.mrf.mxu1  ;;  %v592_v50 = vmax.f32 %v485_v48, 0.0  ;;  %v588_v39 = vmax.f32 %v1381_v8, 0.0  ;;  %v577_v8 = vmax.f32 %v1364_v63, 0.0  ;;  %v1105_v63 = vld [vmem:[%s1468_s3] sm:$0xff]  }
  0xff   : > { %v489_v26 = vadd.f32 %v488_v55, %v356_v46  ;;  %v562_v27 = vadd.f32 %v561_v56, %v356_v46  ;;  %v593_v54 = vmax.f32 %v487_v20, 0.0 }
 0x100   : > { %v490_v57 = vpop.f32.mrf.mxu0  ;;  %v563_v58 = vpop.f32.mrf.mxu1 }
 0x101   : > { %v491_v12 = vadd.f32 %v490_v57, %v356_v46  ;;  %v564_v13 = vadd.f32 %v563_v58, %v356_v46  ;;  %v595_v57 = vmax.f32 %v560_v21, 0.0  ;;  %v596_v56 = vmax.f32 %v489_v26, 0.0 }
 0x102   : > { %v494_v59 = vpop.f32.mrf.mxu0  ;;  %v567_v60 = vpop.f32.mrf.mxu1 }
 0x103   : > { %v495_v22 = vadd.f32 %v494_v59, %v361_v37  ;;  %v568_v23 = vadd.f32 %v567_v60, %v361_v37  ;;  %v597_v32 = vmax.f32 %v491_v12, 0.0  ;;  %v599_v35 = vmax.f32 %v564_v13, 0.0 }
 0x104   : > { %v496_v3 = vpop.f32.mrf.mxu0  ;;  %v569_v4 = vpop.f32.mrf.mxu1  ;;  %v589_v60 = vmax.f32 %v1385_v10, 0.0  ;;  %v594_v13 = vmax.f32 %v558_v51, 0.0  ;;  %v542_v10 = vadd.f32 %v1349_v34, %v1361_v62  ;;  %v620_v53 = vpack.c.bf16 %v596_v56, %v592_v50 }
 0x105   : > { %v497_v16 = vadd.f32 %v496_v3, %v361_v37  ;;  %v570_v17 = vadd.f32 %v569_v4, %v361_v37  ;;  %v600_v52 = vmax.f32 %v495_v22, 0.0  ;;  %v602_v37 = vmax.f32 %v568_v23, 0.0 }
 0x106   : > { %v498_v14 = vpop.f32.mrf.mxu0  ;;  %v571_v15 = vpop.f32.mrf.mxu1  ;;  %v591_v3 = vmax.f32 %v1387_v11, 0.0  ;;  %v621_v4 = vpack.c.bf16 %v597_v32, %v593_v54  ;;  %v623_v12 = vpack.c.bf16 %v599_v35, %v595_v57  ;;  %v585_v11 = vmax.f32 %v1376_v6, 0.0 }
 0x107   : > { %v499_v18 = vadd.f32 %v498_v14, %v366_v45  ;;  %v572_v19 = vadd.f32 %v571_v15, %v366_v45  ;;  %v601_v42 = vmax.f32 %v497_v16, 0.0  ;;  %v603_v43 = vmax.f32 %v570_v17, 0.0  ;;  %v650_v35 = vpop.permute.xlu1 %649 }
 0x108   : > { %v500_v24 = vpop.f32.mrf.mxu0  ;;  %v573_v25 = vpop.f32.mrf.mxu1  ;;  %v469_v14 = vadd.f32 %v1347_v33, %v1361_v62  ;;  %v587_v15 = vmax.f32 %v1379_v7, 0.0  ;;  %v581_v17 = vmax.f32 %v1370_v1, 0.0  ;;  %v617_v33 = vpack.c.bf16 %v589_v60, %v585_v11 }
 0x109   : > { %v501_v28 = vadd.f32 %v500_v24, %v366_v45  ;;  %v574_v31 = vadd.f32 %v573_v25, %v366_v45  ;;  %v604_v36 = vmax.f32 %v499_v18, 0.0  ;;  %v606_v41 = vmax.f32 %v572_v19, 0.0 }
 0x10a   : > { %v598_v45 = vmax.f32 %v562_v27, 0.0  ;;  %v583_v18 = vmax.f32 %v1373_v2, 0.0  ;;  %v619_v19 = vpack.c.bf16 %v591_v3, %v587_v15  ;;  %v465_v34 = vadd.f32 %v1343_v29, %v1359_v61 }
 0x10b   : > { %v605_v44 = vmax.f32 %v501_v28, 0.0  ;;  %v607_v47 = vmax.f32 %v574_v31, 0.0  ;;  %v624_v58 = vpack.c.bf16 %v604_v36, %v600_v52  ;;  %v626_v59 = vpack.c.bf16 %v606_v41, %v602_v37  ;;  %v640_v51 = vpop.permute.xlu1 %639 }
 0x10c   : > { %v622_v16 = vpack.c.bf16 %v598_v45, %v594_v13  ;;  %v538_v62 = vadd.f32 %v1345_v30, %v1359_v61  ;;  %v584_v6 = vmax.f32 %v475_v38, 0.0  ;;  %v586_v7 = vmax.f32 %v548_v49, 0.0 }
 0x10d   : > { %v625_v55 = vpack.c.bf16 %v605_v44, %v601_v42  ;;  %v627_v46 = vpack.c.bf16 %v607_v47, %v603_v43  ;;  %v580_v1 = vmax.f32 %v469_v14, 0.0  ;;  %v582_v2 = vmax.f32 %v542_v10, 0.0  ;;  %v645_v42 = vpop.permute.xlu0 %644 }
 0x10e   : > { %v616_v20 = vpack.c.bf16 %v588_v39, %v584_v6  ;;  %v618_v21 = vpack.c.bf16 %v590_v40, %v586_v7  ;;  %v613_v22 = vpack.c.bf16 %v581_v17, %v577_v8  ;;  %v615_v23 = vpack.c.bf16 %v583_v18, %v579_v9 }
 0x10f   : > { %677 = vmatprep.subr.bf16.mxu0 %v625_v55  ;;  %730 = vmatprep.subr.bf16.mxu1 %v627_v46  ;;  %v576_v29 = vmax.f32 %v465_v34, 0.0  ;;  %v578_v24 = vmax.f32 %v538_v62, 0.0 }
 0x110   : > { %678 = vmatpush1.bf16.msra.mxu0 %v624_v58  ;;  %731 = vmatpush1.bf16.msra.mxu1 %v626_v59 }
 0x111   : > { %679 = vmatprep.subr.bf16.mxu0 %v621_v4  ;;  %732 = vmatprep.subr.bf16.mxu1 %v623_v12  ;;  %v612_v30 = vpack.c.bf16 %v580_v1, %v576_v29  ;;  %v614_v61 = vpack.c.bf16 %v582_v2, %v578_v24 }
 0x114   : > { %680 = vmatpush1.bf16.msra.mxu0 %v620_v53  ;;  %733 = vmatpush1.bf16.msra.mxu1 %v622_v16 }
 0x115   : > { %681 = vmatprep.subr.bf16.mxu0 %v617_v33  ;;  %734 = vmatprep.subr.bf16.mxu1 %v619_v19 }
 0x118   : > { %682 = vmatpush1.bf16.msra.mxu0 %v616_v20  ;;  %735 = vmatpush1.bf16.msra.mxu1 %v618_v21 }
 0x119   : > { %683 = vmatprep.subr.bf16.mxu0 %v613_v22  ;;  %736 = vmatprep.subr.bf16.mxu1 %v615_v23 }
 0x11c   : > { %684 = vmatpush1.bf16.msra.mxu0 %v612_v30  ;;  %737 = vmatpush1.bf16.msra.mxu1 %v614_v61  ;;  %v791_v30 = vld [vmem:[%s1470_s5] sm:$0x1]  ;;  %v806_v61 = vlaneseq }
 0x11e   : > { %vm927_vm4 = vcmp.lt.s32.totalorder %v806_v61, 512 }
 0x11f   : > { %1039 = vmatmul.mubr.msk.bf16.vlgmr.msra.gmra.mxu0 %vm662_vm2, %v1105_v63  ;;  %1041 = vmatmul.mubr.msk.bf16.vlgmr.msra.gmra.mxu1 %vm662_vm2, %v1105_v63  ;;  %v807_v63 = vshrl.u32 %v806_v61, 7 }
 0x120   : > { %711 = vmatprep.mubr.bf16.mxu0 %v1169_v5  ;;  %764 = vmatprep.mubr.bf16.mxu1 %v1169_v5 }
 0x127   : > { %1040 = vmatmul.mubr.msk.bf16.gmra.mxu0 %vm662_vm2, %v1106_v0  ;;  %1042 = vmatmul.mubr.msk.bf16.gmra.mxu1 %vm662_vm2, %v1106_v0  ;;  %v1170_v0 = vmov 1966171168  }
 0x128   : > { %846 = vmatprep.mubr.bf16.mxu0 %v1169_v5  ;;  %887 = vmatprep.mubr.bf16.mxu1 %v1169_v5  ;;  %v635_v5 = vpop.permute.xlu0 %634 }
 0x1df   : > { %v703_v25 = vpop.f32.mrf.mxu0  ;;  %v756_v26 = vpop.f32.mrf.mxu1 }
 0x1e0   : > { %v704_v17 = vadd.f32 %v703_v25, %v635_v5  ;;  %v757_v18 = vadd.f32 %v756_v26, %v635_v5  ;;  %v903_v25 = vunpack.c.l.s4 %v1170_v0  ;;  %v808_v26 = vsub.s32 0, %v807_v63 }
 0x1e1   : > { %v705_v27 = vpop.f32.mrf.mxu0  ;;  %v758_v28 = vpop.f32.mrf.mxu1 }
 0x1e2   : > { %v706_v58 = vadd.f32 %v705_v27, %v635_v5  ;;  %v759_v59 = vadd.f32 %v758_v28, %v635_v5  ;;  %v775_v22 = vmax.f32 %v704_v17, 0.0  ;;  %v777_v23 = vmax.f32 %v757_v18, 0.0  ;;  %v804_v28 = vpop.permute.xlu0 %803 }
 0x1e3   : > { %v707_v31 = vpop.f32.mrf.mxu0  ;;  %v760_v32 = vpop.f32.mrf.mxu1  ;;  %v904_v27 = vunpack.c.0.s8 %v903_v25 }
 0x1e4   : > { %v708_v38 = vadd.f32 %v707_v31, %v640_v51  ;;  %v761_v49 = vadd.f32 %v760_v32, %v640_v51  ;;  %v776_v34 = vmax.f32 %v706_v58, 0.0  ;;  %v778_v62 = vmax.f32 %v759_v59, 0.0 }
 0x1e5   : > { %v709_v36 = vpop.f32.mrf.mxu0  ;;  %v762_v41 = vpop.f32.mrf.mxu1 }
 0x1e6   : > { %v710_v52 = vadd.f32 %v709_v36, %v640_v51  ;;  %v763_v37 = vadd.f32 %v762_v41, %v640_v51  ;;  %v779_v8 = vmax.f32 %v708_v38, 0.0  ;;  %v781_v9 = vmax.f32 %v761_v49, 0.0 }
 0x1e7   : > { %v713_v43 = vpop.f32.mrf.mxu0  ;;  %v766_v44 = vpop.f32.mrf.mxu1  ;;  %v907_v36 = vsub.s32 %v904_v27, %v807_v63 }
 0x1e8   : > { %v714_v60 = vadd.f32 %v713_v43, %v645_v42  ;;  %v767_v3 = vadd.f32 %v766_v44, %v645_v42  ;;  %v780_v14 = vmax.f32 %v710_v52, 0.0  ;;  %v782_v10 = vmax.f32 %v763_v37, 0.0 }
 0x1e9   : > { %v715_v47 = vpop.f32.mrf.mxu0  ;;  %v768_v48 = vpop.f32.mrf.mxu1  ;;  %v792_v29 = vpack.c.bf16 %v779_v8, %v775_v22  ;;  %v794_v24 = vpack.c.bf16 %v781_v9, %v777_v23 }
 0x1ea   : > { %v716_v55 = vadd.f32 %v715_v47, %v645_v42  ;;  %v769_v46 = vadd.f32 %v768_v48, %v645_v42  ;;  %v783_v33 = vmax.f32 %v714_v60, 0.0  ;;  %v785_v19 = vmax.f32 %v767_v3, 0.0 }
 0x1eb   : > { %v717_v54 = vpop.f32.mrf.mxu0  ;;  %v770_v57 = vpop.f32.mrf.mxu1  ;;  %v793_v20 = vpack.c.bf16 %v780_v14, %v776_v34  ;;  %v795_v21 = vpack.c.bf16 %v782_v10, %v778_v62 }
 0x1ec   : > { %v718_v56 = vadd.f32 %v717_v54, %v650_v35  ;;  %v771_v45 = vadd.f32 %v770_v57, %v650_v35  ;;  %v784_v39 = vmax.f32 %v716_v55, 0.0  ;;  %v786_v40 = vmax.f32 %v769_v46, 0.0 }
 0x1ed   : > { %v719_v4 = vpop.f32.mrf.mxu0  ;;  %v772_v12 = vpop.f32.mrf.mxu1 }
 0x1ee   : > { %v720_v50 = vadd.f32 %v719_v4, %v650_v35  ;;  %v773_v13 = vadd.f32 %v772_v12, %v650_v35  ;;  %v787_v11 = vmax.f32 %v718_v56, 0.0  ;;  %v789_v15 = vmax.f32 %v771_v45, 0.0 }
 0x1ef   : > { %v809_v35 = vrot.slane %v804_v28, %v808_v26 }
 0x1f0   : > { %v788_v53 = vmax.f32 %v720_v50, 0.0  ;;  %v790_v16 = vmax.f32 %v773_v13, 0.0  ;;  %v796_v1 = vpack.c.bf16 %v787_v11, %v783_v33  ;;  %v798_v2 = vpack.c.bf16 %v789_v15, %v785_v19 }
 0x1f2   : > { %v797_v6 = vpack.c.bf16 %v788_v53, %v784_v39  ;;  %v799_v7 = vpack.c.bf16 %v790_v16, %v786_v40 }
 0x1f4   : > { %826 = vmatprep.subr.bf16.mxu0 %v797_v6  ;;  %867 = vmatprep.subr.bf16.mxu1 %v799_v7 }
 0x1f5   : > { %827 = vmatpush1.bf16.msra.mxu0 %v796_v1  ;;  %868 = vmatpush1.bf16.msra.mxu1 %v798_v2 }
 0x1f6   : > { %828 = vmatprep.subr.bf16.mxu0 %v793_v20  ;;  %869 = vmatprep.subr.bf16.mxu1 %v795_v21 }
 0x1f9   : > { %829 = vmatpush1.bf16.msra.mxu0 %v792_v29  ;;  %870 = vmatpush1.bf16.msra.mxu1 %v794_v24 }
 0x1fc   : > { %1043 = vmatmul.mubr.msk.bf16.vlgmr.msra.gmra.mxu0 %vm810_vm3, %v791_v30  ;;  %1044 = vmatmul.mubr.msk.bf16.vlgmr.msra.gmra.mxu1 %vm810_vm3, %v791_v30 }
 0x2bc   : > { %v848_v31 = vpop.f32.mrf.mxu0  ;;  %v889_v32 = vpop.f32.mrf.mxu1 }
 0x2bd   : > { %v849_v43 = vadd.f32 %v848_v31, %v809_v35  ;;  %v890_v44 = vadd.f32 %v889_v32, %v809_v35 }
 0x2be   : > { %v850_v41 = vpop.f32.mrf.mxu0  ;;  %v891_v42 = vpop.f32.mrf.mxu1 }
 0x2bf   : > { %v851_v47 = vadd.f32 %v850_v41, %v809_v35  ;;  %v892_v48 = vadd.f32 %v891_v42, %v809_v35 }
 0x2c0   : > { %v852_v51 = vpop.f32.mrf.mxu0  ;;  %v893_v52 = vpop.f32.mrf.mxu1 }
 0x2c1   : > { %v900_v37 = vcombine.low %v849_v43, %v851_v47  ;;  %v901_v54 = vcombine.low %v890_v44, %v892_v48 }
 0x2c2   : > { %v853_v57 = vpop.f32.mrf.mxu0  ;;  %v894_v5 = vpop.f32.mrf.mxu1 }
 0x2c3   : > { %v908_v55 = vrot.slane %v900_v37, %v907_v36  ;;  %v915_v46 = vrot.slane %v901_v54, %v907_v36 }
 0x2c5   : > { %v916_v56 = vcombine.low %v908_v55, %v915_v46 }
 0x2c7   : > { %v923_v45 = vrot.slane %v916_v56, %v907_v36 }
 0x2c9   : > { %929 = vst.msk [vmem:[%s304_s22] sm:$0xf] %vm927_vm4, %v923_v45 }
 0x2ca   : > { %1120 = shalt.err (!%p1117_p5)
}
 0x2cb   : > { %s1121_s16 = scalar_lea.hbm %s943_s30, 64  ;;  %s1125_s18 = scalar_lea.hbm %s1472_s7, 128 }
 0x2cc   : > { %p1122_p7 = scmp.ne.s32.totalorder %s943_s30, %s1121_s16  ;;  %p1126_p12 = scmp.lt.s32.totalorder %s943_s30, %s1472_s7 }
 0x2cd   : > { %p1127_p13 = scmp.lt.s32.totalorder %s1125_s18, %s1121_s16 }
 0x2ce   : > { %p1123_p10 = pnand %p1122_p7, %p1253_p6 }
 0x2cf   : > { %p1128_p0 = por %p1127_p13, %p1126_p12 }
 0x2d0   : > { %p1124_p11 = pneg %p1123_p10 }
 0x2d2   : > { %p1129_p9 = pnand %p1128_p0, %p1124_p11 }
 0x2d4   : > { %1132 = shalt.err (!%p1129_p9)
}
 0x2d5   : > { %1052 = dma.vmem_to_hbm [thread:$0]  (%p1253_p6), %s946_s23, 64, %s943_s30, %s931_s9  }
 0x2d6 PF: > { %s957_s22 = sand.u32 1, %s1155_s26   ;;  %p1476_p1 = scmp.ge.s32.totalorder %s1167_s29, 2 }
 0x2d7   : > { %s958_s24 = scalar_lea.sflag [#allocation5], %s957_s22 }
 0x2d8   : > { %p1055_p2 = pnand %p1476_p1, %p1257_p8 }
 0x2da   : > { %p1056_p3 = pneg %p1055_p2 }
 0x2dc   : > { %1150 = dma.done.wait (%p1056_p3), %s958_s24, 64  }
 0x2dd   : > { %1152 = vsyncadd (%p1056_p3), %s958_s24, 4294967232  ;;  %p19_p9 = scmp.ge.s32.totalorder %s1238_s8, 4   ;;  %s1477_s26 = smov %s1159_s27 }
 0x2de   : > { %s1478_s27 = smov %s1163_s28  ;;  %s1479_s28 = smov %s1251_s11 }
 0x2df   : > { %s1480_s29 = smov %s1238_s8  ;;  %21 = sbr.rel (!%p19_p9) target bundleno = 6 (0x6), region = 111 }
 0x2e4   :  { %963 = vsyncpa [#allocation5], 1 }
 0x2e5   :  { %965 = vsyncpa [#allocation5 + $0x1], 1 }

</bundles_post_ra>
